<compile_context>
chip_gen: v5e
topology: v5e:2x2
jax: 0.10.0
libtpu: 0.0.40
codegen_flags: <defaults>
</compile_context>

<pallas_src>
import math
from functools import reduce
import operator

import jax
import jax.numpy as jnp
from jax.experimental import pallas as pl
from jax.experimental.pallas import tpu as pltpu


def _round_up(x, m):
    return ((x + m - 1) // m) * m


def _sublane_pack(dtype):
    # sublane packing factor: 8 rows for 32-bit, 16 for 16-bit, 32 for 8-bit.
    return max(8, 32 // jnp.dtype(dtype).itemsize)


def _select_kn_tiles(h, i, w_itemsize, tn_max=None, tk_max=None):
    """Pick (tk, tn, H_pad, I_pad) from the static weight dims only, so the
    layer class can pre-pad its weight table once in __init__ and the runtime
    wrapper re-derives the identical tiling."""
    if tk_max is None:
        tk_max = 1024 if w_itemsize >= 4 else 2048
    if tn_max is None:
        tn_max = 512
    tk = min(tk_max, _round_up(h, 128))
    tn = min(tn_max, _round_up(i, 128))
    h_pad = _round_up(h, tk)
    i_pad = _round_up(i, tn)
    return tk, tn, h_pad, i_pad


# --------------------------------------------------------------------------
# Kernels
# --------------------------------------------------------------------------
def _expert_linear_kernel_scratch(idx_ref, x_ref, w_ref, o_ref, acc_ref):
    """Non-f32 outputs: accumulate in an f32 VMEM scratch, cast once at the end.

    idx_ref : SMEM (E,) expert indices (consumed only by the weight index_map)
    x_ref   : (1, tm, tk)   activation tile
    w_ref   : (1, tk, tn)   weight tile for the selected expert
    o_ref   : (1, tm, tn)   output tile
    acc_ref : (tm, tn) f32  accumulator (persists across the K grid axis)
    """
    k = pl.program_id(3)

    @pl.when(k == 0)
    def _():
        acc_ref[...] = jnp.zeros_like(acc_ref)

    acc_ref[...] += jnp.dot(
        x_ref[0], w_ref[0], preferred_element_type=jnp.float32
    )

    @pl.when(k == pl.num_programs(3) - 1)
    def _():
        o_ref[0] = acc_ref[...].astype(o_ref.dtype)


def _expert_linear_kernel_f32out(idx_ref, x_ref, w_ref, o_ref):
    """f32 outputs: the output block is resident across K, accumulate into it
    directly (saves tm*tn*4 bytes of scratch VMEM and a full-tile copy)."""
    k = pl.program_id(3)

    @pl.when(k == 0)
    def _():
        o_ref[...] = jnp.zeros_like(o_ref)

    o_ref[0] += jnp.dot(x_ref[0], w_ref[0], preferred_element_type=jnp.float32)


# --------------------------------------------------------------------------
# Wrapper
# --------------------------------------------------------------------------
def expert_fused_linear_pallas(x_flat, weight, expert_idx, *, x_shared=False,
                               out_features=None, tm_max=512, tn_max=None,
                               tk_max=None, vmem_limit_bytes=48 * 1024 * 1024):
    """Per-expert matmul: out[e] = x[e or 0] @ weight[expert_idx[e]].

    x_flat    : (E_in, T, H)  activations (E_in == len(expert_idx), or 1 if x_shared)
    weight    : (num_experts, H, I) full weight table, OR the same table
                pre-padded to (num_experts, H_pad, I_pad) with the tiling
                derived by _select_kn_tiles (as done by the layer class).
    expert_idx: (E_out,) int32 indices into the expert dim of `weight`
    out_features: logical output dim I (needed when `weight` is pre-padded).
    returns   : (E_out, T, I)
    """
    E_in, T, H = x_flat.shape
    NE, H_w, I_w = weight.shape
    E_out = int(expert_idx.shape[0])
    I = int(out_features) if out_features is not None else int(I_w)

    w_isz = jnp.dtype(weight.dtype).itemsize
    x_isz = jnp.dtype(x_flat.dtype).itemsize
    out_dtype = x_flat.dtype
    o_isz = jnp.dtype(out_dtype).itemsize

    # ---- tiling (K/N tiles depend only on static weight dims) -------------
    tk, tn, H_pad, I_pad = _select_kn_tiles(H, I, w_isz, tn_max, tk_max)

    # Weight: either pre-padded to (H_pad, I_pad) (preferred, done once at
    # init) or raw (H, I) -> pad here as a fallback for standalone use.
    if (H_w, I_w) != (H_pad, I_pad):
        assert (H_w, I_w) == (H, I), (
            f"weight dims {(H_w, I_w)} match neither logical {(H, I)} nor "
            f"padded {(H_pad, I_pad)}")
        if (H_pad, I_pad) != (H, I):
            weight = jnp.pad(weight, ((0, 0), (0, H_pad - H), (0, I_pad - I)))

    # M tile: cover as much of T as possible (weights then stream exactly once
    # per expert), rounded to the dtype's sublane pack factor.
    pack = _sublane_pack(x_flat.dtype)
    tm = min(_round_up(tm_max, pack), _round_up(T, pack))
    T_pad = _round_up(T, tm)

    use_scratch = out_dtype != jnp.float32

    # VMEM fit check (double-buffered x/w/out + optional f32 scratch); with the
    # default caps this is well under budget on every generation.
    def _est(tm_):
        return (2 * tm_ * tk * x_isz + 2 * tk * tn * w_isz
                + 2 * tm_ * tn * o_isz + (tm_ * tn * 4 if use_scratch else 0))
    budget = int(0.85 * vmem_limit_bytes)
    while _est(tm) > budget and tm > pack:
        tm = max(pack, _round_up(tm // 2, pack))
        T_pad = _round_up(T, tm)

    # v7x has 2 TensorCores: keep >= 2 blocks on some parallel axis so the
    # second core isn't idle when a single expert + single M/N block remains.
    if E_out * (T_pad // tm) * (I_pad // tn) < 2:
        while tn % 256 == 0 and (I_pad // tn) < 2:
            tn //= 2

    # Zero-pad activations to tile multiples (zeros contribute nothing).
    if (T_pad, H_pad) != (T, H):
        x_flat = jnp.pad(x_flat, ((0, 0), (0, T_pad - T), (0, H_pad - H)))

    n_m = T_pad // tm
    n_n = I_pad // tn
    grid = (E_out, n_m, n_n, H_pad // tk)

    if x_shared:
        def x_map(e, m, n, k, idx_ref):
            return (0, m, k)          # all experts alias the single activation copy
    else:
        def x_map(e, m, n, k, idx_ref):
            return (e, m, k)

    def w_map(e, m, n, k, idx_ref):
        return (idx_ref[e], k, n)     # in-kernel expert gather via scalar prefetch

    def o_map(e, m, n, k, idx_ref):
        return (e, m, n)

    # Advisory cost estimate: weight is re-read once per M tile, x once per N tile.
    flops = 2 * E_out * T_pad * H_pad * I_pad
    bytes_accessed = (
        (1 if x_shared else E_out) * n_n * T_pad * H_pad * x_isz
        + E_out * n_m * H_pad * I_pad * w_isz
        + E_out * T_pad * I_pad * o_isz
    )

    kernel = _expert_linear_kernel_scratch if use_scratch else _expert_linear_kernel_f32out
    scratch_shapes = [pltpu.VMEM((tm, tn), jnp.float32)] if use_scratch else []

    # Clamp indices into range: an out-of-range index would otherwise trigger an
    # out-of-bounds weight DMA.
    expert_idx = jnp.clip(jnp.asarray(expert_idx, dtype=jnp.int32), 0, NE - 1)

    # TODO(synk): for v5e, if a profile shows exposed weight DMA, sweep
    # pipeline_mode=pl.Buffered(3) on the weight BlockSpec only.
    out = pl.pallas_call(
        kernel,
        out_shape=jax.ShapeDtypeStruct((E_out, T_pad, I_pad), out_dtype),
        grid_spec=pltpu.PrefetchScalarGridSpec(
            num_scalar_prefetch=1,
            grid=grid,
            in_specs=[
                pl.BlockSpec((1, tm, tk), x_map),
                pl.BlockSpec((1, tk, tn), w_map),
            ],
            out_specs=pl.BlockSpec((1, tm, tn), o_map),
            scratch_shapes=scratch_shapes,
        ),
        compiler_params=pltpu.CompilerParams(
            dimension_semantics=("parallel", "parallel", "parallel", "arbitrary"),
            vmem_limit_bytes=int(vmem_limit_bytes),
        ),
        cost_estimate=pl.CostEstimate(
            flops=int(flops), transcendentals=0, bytes_accessed=int(bytes_accessed)
        ),
    )(expert_idx, x_flat, weight)

    if (T_pad, I_pad) != (T, I):
        out = out[:, :T, :I]
    return out


# --------------------------------------------------------------------------
# Module port
# --------------------------------------------------------------------------
class ExpertFusedColumnParallelLinearJAX:
    """JAX/Pallas port of ExpertFusedColumnParallelLinear (single device).

    weight shape: (num_experts, input_size, output_size)  [partition dim 2, TP=1]
    forward: output = einsum('e...h,ehi->e...i', input, weight), bias unsupported.
    """

    def __init__(self, num_experts, input_size, output_size,
                 dtype=jnp.float32, key=None):
        self.num_experts = num_experts
        self.input_size = input_size
        self.output_size = output_size
        if key is None:
            key = jax.random.PRNGKey(0)
        # Kaiming-uniform-ish per-expert init (a=sqrt(5)): bound = 1/sqrt(fan_in).
        bound = 1.0 / math.sqrt(input_size)
        self.weight = jax.random.uniform(
            key, (num_experts, input_size, output_size),
            minval=-bound, maxval=bound, dtype=dtype,
        )
        # Pre-pad the static weight table once (tile sizes depend only on H/I
        # and dtype) so the per-call path never rewrites the table in HBM.
        w_isz = jnp.dtype(dtype).itemsize
        _, _, h_pad, i_pad = _select_kn_tiles(input_size, output_size, w_isz)
        if (h_pad, i_pad) != (input_size, output_size):
            self._weight_padded = jnp.pad(
                self.weight,
                ((0, 0), (0, h_pad - input_size), (0, i_pad - output_size)))
        else:
            self._weight_padded = self.weight

    def __call__(self, input_, expert_indices=None):
        # TODO(synk): copy_to_tensor_model_parallel_region / async_grad_allreduce
        # / expert-parallel weight marking are distributed no-ops for TP=EP=1
        # and are omitted here.
        if expert_indices is not None:
            expert_idx = jnp.asarray(expert_indices, dtype=jnp.int32)
        else:
            expert_idx = jnp.arange(self.num_experts, dtype=jnp.int32)

        e_w = int(expert_idx.shape[0])
        e_in = input_.shape[0]
        if e_in != e_w and e_in > 1:
            raise RuntimeError(
                f"input and weight disagree on number of experts. "
                f"input_shape={input_.shape}, "
                f"weight_shape={(e_w, self.input_size, self.output_size)}"
            )

        inner_shape = input_.shape[1:-1]            # the '...' dims
        h = input_.shape[-1]
        assert h == self.input_size
        t = reduce(operator.mul, inner_shape, 1)

        x_flat = input_.reshape(e_in, t, h)
        x_shared = (e_in == 1 and e_w > 1)          # shared activations across experts

        out_flat = expert_fused_linear_pallas(
            x_flat, self._weight_padded, expert_idx,
            x_shared=x_shared, out_features=self.output_size,
        )
        return out_flat.reshape((e_w,) + tuple(inner_shape) + (self.output_size,))


if __name__ == "__main__":
    key = jax.random.PRNGKey(0)
    k_w, k_x, k_x2, k_w2 = jax.random.split(key, 4)

    # --- small demo consistent with the module ---------------------------
    num_experts = 4
    input_size = 32     # h
    output_size = 64    # i
    inner = (2, 4)      # arbitrary '...' token dims -> 8 tokens per expert

    layer = ExpertFusedColumnParallelLinearJAX(
        num_experts, input_size, output_size, dtype=jnp.float32, key=k_w
    )

    x = jax.random.normal(
        k_x, (num_experts,) + inner + (input_size,), dtype=jnp.float32
    )

    # 1) All experts.
    out = jax.block_until_ready(layer(x))
    ref = jnp.einsum("e...h,ehi->e...i", x, layer.weight)
    assert out.shape == (num_experts,) + inner + (output_size,)
    assert jnp.allclose(out, ref, atol=1e-5, rtol=1e-5), "mismatch (all experts)"

    # 2) expert_indices subset path (gather via scalar-prefetch index_map).
    idx = jnp.array([1, 3], dtype=jnp.int32)
    x_sub = x[idx]
    out_sub = jax.block_until_ready(layer(x_sub, expert_indices=idx))
    ref_sub = jnp.einsum("e...h,ehi->e...i", x_sub, layer.weight[idx])
    assert jnp.allclose(out_sub, ref_sub, atol=1e-5, rtol=1e-5), "mismatch (subset)"

    # 3) Shared-activation path (input expert dim == 1, broadcast via index_map).
    x_one = jax.random.normal(k_x2, (1,) + inner + (input_size,), dtype=jnp.float32)
    out_shared = jax.block_until_ready(layer(x_one))
    ref_shared = jnp.einsum(
        "e...h,ehi->e...i",
        jnp.broadcast_to(x_one, (num_experts,) + inner + (input_size,)),
        layer.weight,
    )
    assert jnp.allclose(out_shared, ref_shared, atol=1e-5, rtol=1e-5), "mismatch (shared x)"

    # 4) Multi-tile f32 path: exercises the K-accumulation loop with the
    #    direct-into-output accumulator and M/N tiling.
    E2, T2, H2, I2 = 2, 16, 256, 256
    w2 = jax.random.normal(k_w2, (E2, H2, I2), dtype=jnp.float32) * 0.05
    x2 = jax.random.normal(k_x2, (E2, T2, H2), dtype=jnp.float32)
    out2 = jax.block_until_ready(
        expert_fused_linear_pallas(
            x2, w2, jnp.arange(E2, dtype=jnp.int32),
            tm_max=8, tn_max=128, tk_max=128,   # grid (2, 2, 2, 2)
        )
    )
    ref2 = jnp.einsum("eth,ehi->eti", x2, w2)
    assert jnp.allclose(out2, ref2, atol=1e-4, rtol=1e-4), "mismatch (tiled K loop, f32)"

    # 5) Multi-tile bf16 path: exercises the f32-scratch accumulator kernel.
    w2b = w2.astype(jnp.bfloat16)
    x2b = x2.astype(jnp.bfloat16)
    out2b = jax.block_until_ready(
        expert_fused_linear_pallas(
            x2b, w2b, jnp.arange(E2, dtype=jnp.int32),
            tm_max=16, tn_max=128, tk_max=128,
        )
    )
    ref2b = jnp.einsum("eth,ehi->eti",
                       x2b.astype(jnp.float32), w2b.astype(jnp.float32))
    assert jnp.allclose(out2b.astype(jnp.float32), ref2b, atol=5e-2, rtol=5e-2), \
        "mismatch (tiled K loop, bf16)"

    print("KERNEL_OK")
</pallas_src>

<mosaic_0001>
module attributes {stable_mosaic.version = 11 : i64} {
  func.func @_expert_linear_kernel_f32out(%arg0: i32, %arg1: i32, %arg2: i32, %arg3: i32, %arg4: memref<4xi32, #tpu.memory_space<smem>>, %arg5: memref<1x8x128xf32, #tpu.memory_space<vmem>>, %arg6: memref<1x128x128xf32, #tpu.memory_space<vmem>>, %arg7: memref<1x8x128xf32, #tpu.memory_space<vmem>>) attributes {dimension_semantics = [#tpu.dimension_semantics<parallel>, #tpu.dimension_semantics<parallel>, #tpu.dimension_semantics<parallel>, #tpu.dimension_semantics<arbitrary>], iteration_bounds = array<i64: 4, 1, 1, 1>, scalar_prefetch = 1 : i64, scratch_operands = 0 : i64, tpu.core_type = #tpu.core_type<tc>, window_params = [{transform_indices = @transform_0, window_bounds = array<i64: 1, 8, 128>}, {transform_indices = @transform_1, window_bounds = array<i64: 1, 128, 128>}, {transform_indices = @transform_2, window_bounds = array<i64: 1, 8, 128>}]} {
    %c0_i32 = arith.constant 0 : i32
    %0 = arith.cmpi eq, %arg3, %c0_i32 : i32
    %1 = arith.extui %0 : i1 to i32
    %c0_i32_0 = arith.constant 0 : i32
    %2 = arith.cmpi ne, %1, %c0_i32_0 : i32
    scf.if %2 {
      %cst_12 = arith.constant 0.000000e+00 : f32
      %14 = vector.broadcast %cst_12 : f32 to vector<1x8x128xf32>
      %c0_13 = arith.constant 0 : index
      %c0_14 = arith.constant 0 : index
      %c0_15 = arith.constant 0 : index
      %15 = vector.load %arg7[%c0_13, %c0_14, %c0_15] : memref<1x8x128xf32, #tpu.memory_space<vmem>>, vector<1x8x128xf32>
      tpu.vector_store %arg7[%c0_13, %c0_14, %c0_15], %14 {strides = array<i32>} : memref<1x8x128xf32, #tpu.memory_space<vmem>>, vector<1x8x128xf32>,
    } else {
    }
    %c0 = arith.constant 0 : index
    %c0_1 = arith.constant 0 : index
    %c0_2 = arith.constant 0 : index
    %3 = vector.load %arg7[%c0, %c0_1, %c0_2] : memref<1x8x128xf32, #tpu.memory_space<vmem>>, vector<1x8x128xf32>
    %4 = vector.shape_cast %3 : vector<1x8x128xf32> to vector<8x128xf32>
    %c0_3 = arith.constant 0 : index
    %c0_4 = arith.constant 0 : index
    %c0_5 = arith.constant 0 : index
    %5 = vector.load %arg5[%c0_3, %c0_4, %c0_5] : memref<1x8x128xf32, #tpu.memory_space<vmem>>, vector<1x8x128xf32>
    %6 = vector.shape_cast %5 : vector<1x8x128xf32> to vector<8x128xf32>
    %c0_6 = arith.constant 0 : index
    %c0_7 = arith.constant 0 : index
    %c0_8 = arith.constant 0 : index
    %7 = vector.load %arg6[%c0_6, %c0_7, %c0_8] : memref<1x128x128xf32, #tpu.memory_space<vmem>>, vector<1x128x128xf32>
    %8 = vector.shape_cast %7 : vector<1x128x128xf32> to vector<128x128xf32>
    %cst = arith.constant dense<0.000000e+00> : vector<8x128xf32>
    %9 = tpu.matmul %6, %8, %cst {dimension_numbers = #tpu.dot_dimension_numbers<[1], [0], [0], [1], [0, 0, 1, 1], [], []>} : vector<8x128xf32>, vector<128x128xf32>, vector<8x128xf32> -> vector<8x128xf32>
    %10 = arith.addf %4, %9 : vector<8x128xf32>
    %c0_9 = arith.constant 0 : index
    %c0_10 = arith.constant 0 : index
    %c0_11 = arith.constant 0 : index
    %11 = vector.load %arg7[%c0_9, %c0_10, %c0_11] : memref<1x8x128xf32, #tpu.memory_space<vmem>>, vector<1x8x128xf32>
    %12 = vector.shape_cast %11 : vector<1x8x128xf32> to vector<8x128xf32>
    %13 = vector.shape_cast %10 : vector<8x128xf32> to vector<1x8x128xf32>
    tpu.vector_store %arg7[%c0_9, %c0_10, %c0_11], %13 {strides = array<i32>} : memref<1x8x128xf32, #tpu.memory_space<vmem>>, vector<1x8x128xf32>,
    return
  }
  func.func @transform_0(%arg0: i32, %arg1: i32, %arg2: i32, %arg3: i32, %arg4: memref<4xi32, #tpu.memory_space<smem>>) -> (i32, i32, i32) {
    %c0_i32 = arith.constant 0 : i32
    return %arg0, %arg1, %arg3 : i32, i32, i32
  }
  func.func @transform_1(%arg0: i32, %arg1: i32, %arg2: i32, %arg3: i32, %arg4: memref<4xi32, #tpu.memory_space<smem>>) -> (i32, i32, i32) {
    %0 = arith.index_cast %arg0 : i32 to index
    %1 = memref.load %arg4[%0] : memref<4xi32, #tpu.memory_space<smem>>
    %c0_i32 = arith.constant 0 : i32
    return %1, %arg3, %arg2 : i32, i32, i32
  }
  func.func @transform_2(%arg0: i32, %arg1: i32, %arg2: i32, %arg3: i32, %arg4: memref<4xi32, #tpu.memory_space<smem>>) -> (i32, i32, i32) {
    %c0_i32 = arith.constant 0 : i32
    return %arg0, %arg1, %arg2 : i32, i32, i32
  }
}

</mosaic_0001>

<bundles_post_ra>
// kernel: tpu_custom_call.1
= control target key start
LH: loop header
LB: loop body
LE: loop exit
PB: predicated region body
PF: predicated region fallthrough
CT: control target
= control target key end

     0   :  { %s741_s15 = smov [#allocation3]   ;;  %s1013_s0 = inlined_call_operand.hbm [shape: s32[4], index: 0, kind: input, shape index: {}]   ;;  %s1014_s1 = inlined_call_operand.hbm [shape: f32[4,8,128], index: 1, kind: input, shape index: {}]   ;;  %s1015_s2 = inlined_call_operand.hbm [shape: f32[4,128,128], index: 2, kind: input, shape index: {}]   ;;  %s1016_s3 = inlined_call_operand.hbm [shape: f32[4,8,128], index: 3, kind: output, shape index: {}]  }
   0x1   :  { %1019 = sst [smem:[#allocation19_spill]] %s1014_s1  ;;  %s9_s14 = sshll.u32 %s1013_s0, 4  ;;  %s10_s14 = int_to_ptr.hbm [resolvable:$true] %s9_s14 }
   0x2   :  { %12 = dma.hbm_to_smem %s10_s14, 16, %s741_s15, [#allocation2] }
   0x3   :  { %691 = dma.done.wait [#allocation2], 16 }
   0x4   :  { %692 = vsyncadd [#allocation2], 4294967280 }
   0x5   :  { %15 = sfence }
   0x6   :  { %16 = vsyncpa [#allocation5], 0 }
   0x7   :  { %18 = vsyncpa [#allocation5 + $0x1], 0 }
   0x8   :  { %19 = vsyncpa [#allocation8], 0 }
   0x9   :  { %21 = vsyncpa [#allocation8 + $0x1], 0 }
   0xa   :  { %22 = vsyncpa [#allocation6], 0 }
   0xb   :  { %24 = vsyncpa [#allocation6 + $0x1], 0  ;;  %s767_s16 = smov 0   ;;  %s769_s17 = smov 0  }
   0xc   :  { %s771_s18 = smov 0   ;;  %s773_s19 = smov 0  }
   0xd   :  { %s775_s0 = smov 0   ;;  %s777_s20 = smov 0  }
   0xe   :  { %s779_s21 = smov 0   ;;  %s781_s22 = smov 0  }
   0xf   :  { %s783_s23 = smov 0  }
  0x10 LB: > { %1020 = sst [smem:[#allocation16_spill]] %s735_s22  ;;  %s438_s24 = sadd.s32 4294967295, %s739_s23   ;;  %s739_s23 = sphi %s783_s23, %s30_s23   ;;  %s735_s22 = sphi %s781_s22, %s1034_s22   ;;  %s731_s21 = sphi %s779_s21, %s1033_s21   ;;  %s727_s20 = sphi %s777_s20, %s1040_s20   ;;  %s723_s0 = sphi %s775_s0, %s1039_s0   ;;  %s719_s19 = sphi %s773_s19, %s1038_s19   ;;  %s715_s18 = sphi %s771_s18, %s1037_s18   ;;  %s711_s17 = sphi %s769_s17, %s1036_s17   ;;  %s707_s16 = sphi %s767_s16, %s1035_s16  }
  0x11   : > { %s439_s25 = sadd.s32 4294967294, %s739_s23   ;;  %s56_s26 = sadd.s32 1, %s735_s22 }
  0x12   : > { %p58_p0 = scmp.ge.s32.totalorder %s56_s26, 4  ;;  %s67_s27 = sadd.s32 1, %s727_s20 }
  0x13   : > { %p74_p1 = scmp.ne.s32.totalorder %s727_s20, %s723_s0  ;;  %p80_p2 = scmp.ne.s32.totalorder %s723_s0, %s719_s19 }
  0x14   : > { %s1042_s26 = smov (%p58_p0, %s56_s26), 0  ;;  %p75_p3 = scmp.eq.s32.totalorder %s739_s23, 0 }
  0x15   : > { %1021 = sst [smem:[#allocation17_spill]] %s1042_s26  ;;  %p823_p4 = scmp.eq.s32.totalorder %s438_s24, 0 }
  0x16   : > { %s60_s29 = ssub.s32 %s735_s22, %s1042_s26  ;;  %s90_s30 = sld [smem:[#allocation3 + %s735_s22]] }
  0x17   : > { %p65_p5 = scmp.eq.s32.totalorder %s60_s29, 0  ;;  %p835_p6 = por %p823_p4, %p80_p2 }
  0x18   : > { %p844_p7 = por %p75_p3, %p74_p1  ;;  %s91_s6 = sld [smem:[#allocation3 + %s1042_s26]] }
  0x19   : > { %s850_s7 = scalar_select %p65_p5, %s727_s20, %s67_s27  }
  0x1a   : > { %s99_s8 = sadd.s32 1, %s715_s18  ;;  %p112_p8 = scmp.ne.s32.totalorder %s711_s17, %s707_s16 }
  0x1b   : > { %1025 = sst [smem:[#allocation18_spill]] %s850_s7  ;;  %p140_p9 = scmp.eq.s32.totalorder %s438_s24, 3 }
  0x1c   : > { %p146_p10 = scmp.eq.s32.totalorder %s439_s25, 3  ;;  %p106_p11 = scmp.ne.s32.totalorder %s715_s18, %s711_s17 }
  0x1d   : > { %p859_p12 = por %p112_p8, %p823_p4  ;;  %p866_p13 = por %p140_p9, %p74_p1 }
  0x1e   : > { %p873_p0 = por %p146_p10, %p80_p2  ;;  %s92_s12 = ssub.s32 %s90_s30, %s91_s6 }
  0x1f   : > { %p97_p4 = scmp.eq.s32.totalorder %s92_s12, 0  ;;  %p477_p5 = scmp.lt.s32.totalorder %s739_s23, 4 }
  0x20   : > { %s166_s13 = sand.u32 1, %s727_s20   ;;  %s443_s14 = sshll.u32 %s735_s22, 3 }
  0x21   : > { %s881_s15 = scalar_select %p97_p4, %s715_s18, %s99_s8  }
  0x22   : > { %s442_s16 = sshll.u32 %s166_s13, 3  ;;  %s1029_s1 = sld [smem:[#allocation19_spill]] }
  0x23   : > { %s170_s29 = scalar_lea.vmem [#allocation4], %s442_s16  ;;  %p465_p1 = pnand %p477_p5, %p844_p7 }
  0x24   : > { %s180_s26 = sshll.u32 %s170_s29, 4  ;;  %p447_p2 = scmp.ge.s32.totalorder %s739_s23, 1  ;;  %s181_s26 = int_to_ptr.vmem [resolvable:$true] %s180_s26 }
  0x25   : > { %p108_p8 = por %p106_p11, %p75_p3  ;;  %p211_p9 = scmp.lt.s32.totalorder %s739_s23, 5 }
  0x26   : > { %s187_s30 = sand.u32 1, %s715_s18   ;;  %s167_s6 = scalar_lea.sflag [#allocation5], %s166_s13 }
  0x27   : > { %p898_p10 = pnand %p447_p2, %p211_p9  ;;  %s444_s12 = sshll.u32 %s187_s30, 7 }
  0x28   : > { %s176_s27 = scalar_lea.hbm %s1029_s1, %s443_s14  ;;  %p904_p4 = pnand %p477_p5, %p108_p8 }
  0x29   : > { %s178_s28 = sshll.u32 %s176_s27, 4  ;;  %s191_s13 = scalar_lea.vmem [#allocation7], %s444_s12  ;;  %s179_s28 = int_to_ptr.hbm [resolvable:$true] %s178_s28 }
  0x2a   : > { %467 = dma.hbm_to_vmem [thread:$0]  (!%p465_p1), %s179_s28, 128, %s181_s26, %s167_s6  }
  0x2b   : > { %s457_s5 = scalar_select %p108_p8, [#allocation3], [#allocation10] }
  0x2c   : > { %s458_s16 = scalar_select %p108_p8, %s735_s22, 0 }
  0x2d   : > { %s1044_s5 = smov (!%p477_p5, %s457_s5), [#allocation11]  ;;  %s203_s26 = sshll.u32 %s191_s13, 4  ;;  %s204_s26 = int_to_ptr.vmem [resolvable:$true] %s203_s26 }
  0x2e   : > { %s1046_s16 = smov (!%p477_p5, %s458_s16), 0  ;;  %s188_s1 = scalar_lea.sflag [#allocation8], %s187_s30 }
  0x2f   : > { %s192_s24 = sld [smem:[%s1044_s5 + %s1046_s16]]  ;;  %p601_p7 = pneg %p904_p4 }
  0x30   : > { %s604_s16 = scalar_lea.hbm %s1015_s2, 512 }
  0x35   : > { %s455_s25 = sshll.u32 %s192_s24, 7 }
  0x36   : > { %s200_s29 = scalar_lea.hbm %s1015_s2, %s455_s25 }
  0x37   : > { %s201_s6 = sshll.u32 %s200_s29, 4  ;;  %s202_s6 = int_to_ptr.hbm [resolvable:$true] %s201_s6 }
  0x38   : > { %s597_s7 = sshra.s32 %s202_s6, 4  ;;  %s598_s7 = int_to_ptr.hbm [resolvable:$true] %s597_s7 }
  0x39   : > { %s599_s22 = scalar_lea.hbm %s598_s7, 128  ;;  %p605_p1 = scmp.lt.s32.totalorder %s598_s7, %s1015_s2 }
  0x3a   : > { %p600_p3 = scmp.ne.s32.totalorder %s598_s7, %s599_s22  ;;  %p606_p2 = scmp.lt.s32.totalorder %s604_s16, %s599_s22 }
  0x3c   : > { %p602_p11 = pnand %p601_p7, %p600_p3  ;;  %p607_p8 = por %p606_p2, %p605_p1 }
  0x3e   : > { %p603_p5 = pneg %p602_p11 }
  0x40   : > { %p608_p9 = pnand %p607_p8, %p603_p5 }
  0x42   : > { %611 = shalt.err (!%p608_p9)
}
  0x43   : > { %s742_s30 = smov 128   ;;  %s743_s25 = smov 8  }
  0x44   : > { %472 = dma.hbm_to_vmem [thread:$0]  (!%p904_p4), %s202_s6, 2048, %s204_s26, %s188_s1, %s742_s30, %s742_s30, %s743_s25  }
  0x45   : > { %215 = sbr.rel (%p898_p10) target bundleno = 240 (0xf0), region = 28  ;;  %s929_s27 = sand.u32 (!%p898_p10), 1, %s723_s0  }
  0x46   : > { %s448_s7 = sshll.u32 (!%p898_p10), %s929_s27, 3  ;;  %s218_s22 = scalar_lea.sflag (!%p898_p10), [#allocation5], %s929_s27 }
  0x47   : > { %s935_s28 = scalar_lea.vmem (!%p898_p10), [#allocation4], %s448_s7 }
  0x4a   : > { %694 = dma.done.wait (%p835_p6), %s218_s22, 128  }
  0x4b   : > { %696 = vsyncadd (%p835_p6), %s218_s22, 4294967168  ;;  %s227_s1 = sand.u32 1, %s711_s17  }
  0x4c   : > { %s449_s8 = sshll.u32 %s227_s1, 7  ;;  %s228_s14 = scalar_lea.sflag [#allocation8], %s227_s1 }
  0x4d   : > { %s942_s26 = scalar_lea.vmem [#allocation7], %s449_s8 }
  0x4e   : > { %698 = dma.done.wait (%p859_p12), %s228_s14, 2048  }
  0x4f   : > { %700 = vsyncadd (%p859_p12), %s228_s14, 4294965248  ;;  %v282_v0 = vld [vmem:[%s942_s26 + $0x78] sm:$0xff]  ;;  %v281_v1 = vld [vmem:[%s942_s26 + $0x70] sm:$0xff]  ;;  %s452_s4 = sshll.u32 %s731_s21, 3  ;;  %s257_s5 = scalar_lea.vmem [#allocation9], %s448_s7 }
  0x50   : > { %283 = vmatpush.msra.mxu0 %v282_v0  ;;  %v280_v2 = vld [vmem:[%s942_s26 + $0x68] sm:$0xff]  ;;  %v279_v3 = vld [vmem:[%s942_s26 + $0x60] sm:$0xff]  ;;  %v278_v4 = vld [vmem:[%s942_s26 + $0x58] sm:$0xff]  ;;  %s318_s6 = scalar_lea.hbm %s1016_s3, %s452_s4  ;;  %s320_s12 = sshll.u32 %s257_s5, 4  ;;  %s321_s12 = int_to_ptr.vmem [resolvable:$true] %s320_s12 }
  0x51   : > { %v277_v5 = vld [vmem:[%s942_s26 + $0x50] sm:$0xff]  ;;  %v276_v6 = vld [vmem:[%s942_s26 + $0x48] sm:$0xff]  ;;  %v275_v7 = vld [vmem:[%s942_s26 + $0x40] sm:$0xff]  ;;  %s322_s16 = sshll.u32 %s318_s6, 4  ;;  %s306_s24 = scalar_lea.sflag [#allocation6], %s929_s27  ;;  %s323_s16 = int_to_ptr.hbm [resolvable:$true] %s322_s16 }
  0x52   : > { %284 = vmatpush.msra.mxu0 %v281_v1  ;;  %v274_v8 = vld [vmem:[%s942_s26 + $0x38] sm:$0xff]  ;;  %v273_v9 = vld [vmem:[%s942_s26 + $0x30] sm:$0xff]  ;;  %v272_v10 = vld [vmem:[%s942_s26 + $0x28] sm:$0xff]  ;;  %s641_s13 = sshra.s32 %s323_s16, 4  ;;  %s647_s22 = scalar_lea.hbm %s1016_s3, 32  ;;  %s642_s13 = int_to_ptr.hbm [resolvable:$true] %s641_s13 }
  0x53   : > { %v271_v11 = vld [vmem:[%s942_s26 + $0x20] sm:$0xff]  ;;  %v270_v12 = vld [vmem:[%s942_s26 + $0x18] sm:$0xff]  ;;  %v269_v13 = vld [vmem:[%s942_s26 + $0x10] sm:$0xff]  ;;  %s643_s30 = scalar_lea.hbm %s642_s13, 8  ;;  %p648_p4 = scmp.lt.s32.totalorder %s642_s13, %s1016_s3 }
  0x54   : > { %285 = vmatpush.msra.mxu0 %v280_v2  ;;  %v268_v14 = vld [vmem:[%s942_s26 + $0x8] sm:$0xff]  ;;  %v267_v15 = vld [vmem:[%s942_s26] sm:$0xff]  ;;  %v266_v16 = vld [vmem:[%s935_s28] sm:$0xff]  ;;  %p644_p6 = scmp.ne.s32.totalorder %s642_s13, %s643_s30  ;;  %p649_p3 = scmp.lt.s32.totalorder %s647_s22, %s643_s30 }
  0x56   : > { %286 = vmatpush.msra.mxu0 %v279_v3  ;;  %p645_p12 = pnand %p644_p6, %p866_p13  ;;  %p650_p7 = por %p649_p3, %p648_p4 }
  0x58   : > { %287 = vmatpush.msra.mxu0 %v278_v4  ;;  %p646_p10 = pneg %p645_p12 }
  0x5a   : > { %288 = vmatpush.msra.mxu0 %v277_v5  ;;  %p651_p11 = pnand %p650_p7, %p646_p10 }
  0x5c   : > { %289 = vmatpush.msra.mxu0 %v276_v6 }
  0x5e   : > { %290 = vmatpush.msra.mxu0 %v275_v7 }
  0x60   : > { %291 = vmatpush.msra.mxu0 %v274_v8 }
  0x62   : > { %292 = vmatpush.msra.mxu0 %v273_v9 }
  0x64   : > { %293 = vmatpush.msra.mxu0 %v272_v10 }
  0x66   : > { %294 = vmatpush.msra.mxu0 %v271_v11 }
  0x68   : > { %295 = vmatpush.msra.mxu0 %v270_v12 }
  0x6a   : > { %296 = vmatpush.msra.mxu0 %v269_v13 }
  0x6c   : > { %297 = vmatpush.msra.mxu0 %v268_v14 }
  0x6e   : > { %298 = vmatpush.msra.mxu0 %v267_v15 }
  0x6f   : > { %299 = vmatmul.f32.vlgmr.msra.gmra.mxu0 %v266_v16 }
  0xec   : > { %v300_v17 = vpop.f32.mrf.mxu0 }
  0xed   : > { %304 = vst [vmem:[%s257_s5] sm:$0xff] %v300_v17 }
  0xee   : > { %654 = shalt.err (!%p651_p11)
}
  0xef   : > { %462 = dma.vmem_to_hbm [thread:$0]  (%p866_p13), %s321_s12, 128, %s323_s16, %s306_s24  }
  0xf0 PF: > { %p478_p5 = scmp.ge.s32.totalorder %s739_s23, 2  ;;  %s334_s27 = sand.u32 1, %s719_s19  }
  0xf1   : > { %s335_s1 = scalar_lea.sflag [#allocation6], %s334_s27 }
  0xf2   : > { %p474_p1 = pnand %p478_p5, %p873_p0 }
  0xf4   : > { %p475_p2 = pneg %p474_p1 }
  0xf6   : > { %702 = dma.done.wait (%p475_p2), %s335_s1, 128  }
  0xf7   : > { %704 = vsyncadd (%p475_p2), %s335_s1, 4294967168  ;;  %s30_s23 = sadd.s32 1, %s739_s23   ;;  %s1032_s10 = sld [smem:[#allocation18_spill]] }
  0xf8   : > { %p27_p8 = scmp.ge.s32.totalorder %s30_s23, 6   ;;  %s1033_s21 = sld [smem:[#allocation16_spill]] }
  0xf9   : > { %s1034_s22 = sld [smem:[#allocation17_spill]]  ;;  %s1035_s16 = smov %s711_s17 }
  0xfa   : > { %s1036_s17 = smov %s715_s18  ;;  %s1037_s18 = smov %s881_s15 }
  0xfb   : > { %s1038_s19 = smov %s723_s0  ;;  %s1039_s0 = smov %s727_s20 }
  0xfc   :  { %29 = sbr.rel (!%p27_p8) target bundleno = 16 (0x10), region = 90 }
  0xfd   : > { %s1040_s20 = smov %s1032_s10 }
 0x101   :  { %341 = vsyncpa [#allocation5], 1 }
 0x102   :  { %343 = vsyncpa [#allocation5 + $0x1], 1 }
 0x103   :  { %344 = vsyncpa [#allocation8], 1 }
 0x104   :  { %346 = vsyncpa [#allocation8 + $0x1], 1 }
 0x105   :  { %347 = vsyncpa [#allocation6], 1 }
 0x106   :  { %349 = vsyncpa [#allocation6 + $0x1], 1 }

</bundles_post_ra>
